<compile_context>
chip_gen: v5e
topology: v5e:2x2
jax: 0.10.0
libtpu: 0.0.40
codegen_flags: <defaults>
</compile_context>

<pallas_src>
import jax
import jax.numpy as jnp
from jax.experimental import pallas as pl
from jax.experimental.pallas import tpu as pltpu

INPUT_DIM = 32
HIDDEN_DIM = 64       # fixed by the module: nn.Linear(input_dim, 64)
OUTPUT_DIM = 32
LN_EPS = 1e-5         # torch.nn.LayerNorm default eps


def _round_up(x, m):
    return ((x + m - 1) // m) * m


def _block_diag(w, p):
    """(din, dout) -> (p*din, p*dout) with `w` repeated along the diagonal."""
    din, dout = w.shape
    eye = jnp.eye(p, dtype=w.dtype)
    return jnp.einsum("ij,kl->ikjl", eye, w).reshape(p * din, p * dout)


def avencoder_kernel(x_ref, w1_ref, b1_ref, w2_ref, b2_ref, g_ref, be_ref,
                     lnm_ref, o_ref):
    # x_ref: (tm_p, P*d_in) in the streamed I/O dtype (f32 or bf16).
    x = x_ref[...]

    # Linear 1 (block-diagonal) + bias + ReLU.  MXU matmul, f32 accumulate.
    h = jnp.dot(x, w1_ref[...], preferred_element_type=jnp.float32) + b1_ref[...]
    h = jnp.maximum(h, 0.0)

    # Linear 2 (block-diagonal).  Cast h back to the weight dtype so bf16
    # inputs keep the native bf16 MXU path; accumulate in f32.
    y = jnp.dot(h.astype(w2_ref.dtype), w2_ref[...],
                preferred_element_type=jnp.float32) + b2_ref[...]

    # Per-logical-row LayerNorm.  lnm = block_diag_P((1/d_out)*ones(d_out)),
    # so one matmul broadcasts each segment's mean across its own segment —
    # everything stays lane-dense and the (idle) MXU does the reductions.
    mean = jnp.dot(y, lnm_ref[...], preferred_element_type=jnp.float32)
    c = y - mean
    var = jnp.dot(c * c, lnm_ref[...], preferred_element_type=jnp.float32)
    y_norm = c * jax.lax.rsqrt(var + LN_EPS)

    o_ref[...] = (y_norm * g_ref[...] + be_ref[...]).astype(o_ref.dtype)


def avencoder_forward(av, params, *, tm=8192, x_buffers=2, vmem_limit_bytes=None):
    """av: (..., d_in) -> (..., d_out); same dtype in/out (f32 or bf16).

    tm: logical rows per grid step (default 8192).  x_buffers: pipeline depth
    for the streamed x block (raise above 2 only if profiling shows exposed
    input DMA).  vmem_limit_bytes: pass when sweeping tm far above 8192.
    """
    w1, b1, w2, b2, gamma, beta = params
    lead_shape = av.shape[:-1]
    d_in = av.shape[-1]
    d_hid = w1.shape[1]
    d_out = w2.shape[1]

    x2d = av.reshape(-1, d_in)
    n_rows = x2d.shape[0]

    # Lane-packing factor (free reshape only — never a pad/copy).
    if n_rows % 4 == 0:
        pack = 4          # 128-lane-dense fast path
    elif n_rows % 2 == 0:
        pack = 2
    else:
        pack = 1          # odd row counts fall back to masked 32-lane stores
    n_packed = n_rows // pack
    xp = x2d.reshape(n_packed, pack * d_in)

    # Sublane multiple: 8 for 32-bit dtypes, 16 for 16-bit (bf16 packing rule).
    sub = 8 if av.dtype.itemsize == 4 else 16
    tm_p = max(sub, (tm // pack // sub) * sub)
    # Clamp for tiny inputs (avoids MiB-scale VMEM blocks for a few rows);
    # this never introduces any data padding — the tail block is masked.
    tm_p = min(tm_p, _round_up(n_packed, sub))

    # Host-side parameter packing (built once per shape under jit).
    w_dtype = av.dtype
    w1p = _block_diag(w1.astype(jnp.float32), pack).astype(w_dtype)
    w2p = _block_diag(w2.astype(jnp.float32), pack).astype(w_dtype)
    b1p = jnp.tile(b1.astype(jnp.float32), pack).reshape(1, pack * d_hid)
    b2p = jnp.tile(b2.astype(jnp.float32), pack).reshape(1, pack * d_out)
    gp = jnp.tile(gamma.astype(jnp.float32), pack).reshape(1, pack * d_out)
    bep = jnp.tile(beta.astype(jnp.float32), pack).reshape(1, pack * d_out)
    ln_mean = _block_diag(jnp.full((d_out, d_out), 1.0 / d_out, jnp.float32), pack)

    grid = (pl.cdiv(n_packed, tm_p),)
    resident = lambda shape: pl.BlockSpec(shape, lambda i: (0, 0))
    x_spec_kwargs = {}
    if x_buffers != 2:
        x_spec_kwargs["pipeline_mode"] = pl.Buffered(x_buffers)

    outp = pl.pallas_call(
        avencoder_kernel,
        out_shape=jax.ShapeDtypeStruct((n_packed, pack * d_out), av.dtype),
        grid=grid,
        in_specs=[
            pl.BlockSpec((tm_p, pack * d_in), lambda i: (i, 0), **x_spec_kwargs),
            resident((pack * d_in, pack * d_hid)),     # W1 (block-diag, resident)
            resident((1, pack * d_hid)),               # b1
            resident((pack * d_hid, pack * d_out)),    # W2 (block-diag, resident)
            resident((1, pack * d_out)),               # b2
            resident((1, pack * d_out)),               # gamma
            resident((1, pack * d_out)),               # beta
            resident((pack * d_out, pack * d_out)),    # LN segment-mean matrix
        ],
        out_specs=pl.BlockSpec((tm_p, pack * d_out), lambda i: (i, 0)),
        compiler_params=pltpu.CompilerParams(
            dimension_semantics=("parallel",),
            vmem_limit_bytes=vmem_limit_bytes),
    )(xp, w1p, b1p, w2p, b2p, gp, bep, ln_mean)

    return outp.reshape(*lead_shape, d_out)


def init_params(key, d_in=INPUT_DIM, d_hid=HIDDEN_DIM, d_out=OUTPUT_DIM):
    k1, k2, k3, k4 = jax.random.split(key, 4)
    # Deterministic synthetic init (uniform, roughly torch-Linear-like scale).
    lim1 = 1.0 / jnp.sqrt(d_in)
    lim2 = 1.0 / jnp.sqrt(d_hid)
    w1 = jax.random.uniform(k1, (d_in, d_hid), jnp.float32, -lim1, lim1)
    b1 = jax.random.uniform(k2, (d_hid,), jnp.float32, -lim1, lim1)
    w2 = jax.random.uniform(k3, (d_hid, d_out), jnp.float32, -lim2, lim2)
    b2 = jax.random.uniform(k4, (d_out,), jnp.float32, -lim2, lim2)
    gamma = jnp.ones((d_out,), jnp.float32)   # LayerNorm weight init
    beta = jnp.zeros((d_out,), jnp.float32)   # LayerNorm bias init
    return (w1, b1, w2, b2, gamma, beta)


def reference_forward(av, params):
    w1, b1, w2, b2, gamma, beta = params
    h = jnp.maximum(av @ w1 + b1, 0.0)
    y = h @ w2 + b2
    mean = jnp.mean(y, axis=-1, keepdims=True)
    var = jnp.mean((y - mean) ** 2, axis=-1, keepdims=True)
    return (y - mean) * jax.lax.rsqrt(var + LN_EPS) * gamma + beta


if __name__ == "__main__":
    key = jax.random.PRNGKey(0)
    k_param, k_x1, k_x2, k_x3 = jax.random.split(key, 4)

    params = init_params(k_param)

    # (batch=2, seq=8, input_dim=32): 16 rows -> P=4 lane-dense fast path.
    av = jax.random.normal(k_x1, (2, 8, INPUT_DIM), jnp.float32)
    out = jax.block_until_ready(avencoder_forward(av, params))
    ref = reference_forward(av, params)
    assert out.shape == (2, 8, OUTPUT_DIM)
    assert jnp.allclose(out, ref, atol=1e-4, rtol=1e-4), "mismatch vs reference"

    # Ragged row count (150 rows): exercises the P=2 path and the cdiv partial
    # tail block — no host-side padding or output slicing anywhere.
    av2 = jax.random.normal(k_x2, (3, 50, INPUT_DIM), jnp.float32)
    out2 = jax.block_until_ready(avencoder_forward(av2, params))
    ref2 = reference_forward(av2, params)
    assert out2.shape == (3, 50, OUTPUT_DIM)
    assert jnp.allclose(out2, ref2, atol=1e-4, rtol=1e-4), "mismatch (ragged)"

    # bf16 streamed I/O (halves HBM bytes per row; LN math stays f32 in-kernel).
    av3 = jax.random.normal(k_x3, (4, 16, INPUT_DIM), jnp.float32).astype(jnp.bfloat16)
    out3 = jax.block_until_ready(avencoder_forward(av3, params))
    params_rounded = tuple(
        p.astype(jnp.bfloat16).astype(jnp.float32) if p.ndim == 2 else p
        for p in params)  # round the matmul weights like the kernel does
    ref3 = reference_forward(av3.astype(jnp.float32), params_rounded)
    assert out3.shape == (4, 16, OUTPUT_DIM)
    assert out3.dtype == jnp.bfloat16
    assert jnp.allclose(out3.astype(jnp.float32), ref3, atol=1e-1, rtol=1e-1), \
        "mismatch (bf16)"

    print("KERNEL_OK")
</pallas_src>

<mosaic_0001>
module attributes {stable_mosaic.version = 11 : i64} {
  func.func @avencoder_kernel(%arg0: i32, %arg1: memref<8x128xf32, #tpu.memory_space<vmem>>, %arg2: memref<128x256xf32, #tpu.memory_space<vmem>>, %arg3: memref<1x256xf32, #tpu.memory_space<vmem>>, %arg4: memref<256x128xf32, #tpu.memory_space<vmem>>, %arg5: memref<1x128xf32, #tpu.memory_space<vmem>>, %arg6: memref<1x128xf32, #tpu.memory_space<vmem>>, %arg7: memref<1x128xf32, #tpu.memory_space<vmem>>, %arg8: memref<128x128xf32, #tpu.memory_space<vmem>>, %arg9: memref<8x128xf32, #tpu.memory_space<vmem>>) attributes {dimension_semantics = [#tpu.dimension_semantics<parallel>], iteration_bounds = array<i64: 1>, scalar_prefetch = 0 : i64, scratch_operands = 0 : i64, tpu.core_type = #tpu.core_type<tc>, window_params = [{transform_indices = @transform_0, window_bounds = array<i64: 8, 128>}, {pipeline_mode = #tpu.pipeline_mode<synchronous>, transform_indices = @transform_1, window_bounds = array<i64: 128, 256>}, {pipeline_mode = #tpu.pipeline_mode<synchronous>, transform_indices = @transform_2, window_bounds = array<i64: 1, 256>}, {pipeline_mode = #tpu.pipeline_mode<synchronous>, transform_indices = @transform_3, window_bounds = array<i64: 256, 128>}, {pipeline_mode = #tpu.pipeline_mode<synchronous>, transform_indices = @transform_4, window_bounds = array<i64: 1, 128>}, {pipeline_mode = #tpu.pipeline_mode<synchronous>, transform_indices = @transform_5, window_bounds = array<i64: 1, 128>}, {pipeline_mode = #tpu.pipeline_mode<synchronous>, transform_indices = @transform_6, window_bounds = array<i64: 1, 128>}, {pipeline_mode = #tpu.pipeline_mode<synchronous>, transform_indices = @transform_7, window_bounds = array<i64: 128, 128>}, {transform_indices = @transform_8, window_bounds = array<i64: 8, 128>}]} {
    %c0 = arith.constant 0 : index
    %c0_0 = arith.constant 0 : index
    %0 = vector.load %arg1[%c0, %c0_0] : memref<8x128xf32, #tpu.memory_space<vmem>>, vector<8x128xf32>
    %c0_1 = arith.constant 0 : index
    %c0_2 = arith.constant 0 : index
    %1 = vector.load %arg2[%c0_1, %c0_2] : memref<128x256xf32, #tpu.memory_space<vmem>>, vector<128x256xf32>
    %cst = arith.constant dense<0.000000e+00> : vector<8x256xf32>
    %2 = tpu.matmul %0, %1, %cst {dimension_numbers = #tpu.dot_dimension_numbers<[1], [0], [0], [1], [0, 0, 1, 1], [], []>} : vector<8x128xf32>, vector<128x256xf32>, vector<8x256xf32> -> vector<8x256xf32>
    %c0_3 = arith.constant 0 : index
    %c0_4 = arith.constant 0 : index
    %3 = vector.load %arg3[%c0_3, %c0_4] : memref<1x256xf32, #tpu.memory_space<vmem>>, vector<1x256xf32>
    %4 = vector.broadcast %3 : vector<1x256xf32> to vector<8x256xf32>
    %5 = arith.addf %2, %4 : vector<8x256xf32>
    %cst_5 = arith.constant 0.000000e+00 : f32
    %6 = vector.broadcast %cst_5 : f32 to vector<8x256xf32>
    %7 = arith.maximumf %5, %6 : vector<8x256xf32>
    %c0_6 = arith.constant 0 : index
    %c0_7 = arith.constant 0 : index
    %8 = vector.load %arg4[%c0_6, %c0_7] : memref<256x128xf32, #tpu.memory_space<vmem>>, vector<256x128xf32>
    %cst_8 = arith.constant dense<0.000000e+00> : vector<8x128xf32>
    %9 = tpu.matmul %7, %8, %cst_8 {dimension_numbers = #tpu.dot_dimension_numbers<[1], [0], [0], [1], [0, 0, 1, 1], [], []>} : vector<8x256xf32>, vector<256x128xf32>, vector<8x128xf32> -> vector<8x128xf32>
    %c0_9 = arith.constant 0 : index
    %c0_10 = arith.constant 0 : index
    %10 = vector.load %arg5[%c0_9, %c0_10] : memref<1x128xf32, #tpu.memory_space<vmem>>, vector<1x128xf32>
    %11 = vector.broadcast %10 : vector<1x128xf32> to vector<8x128xf32>
    %12 = arith.addf %9, %11 : vector<8x128xf32>
    %c0_11 = arith.constant 0 : index
    %c0_12 = arith.constant 0 : index
    %13 = vector.load %arg8[%c0_11, %c0_12] : memref<128x128xf32, #tpu.memory_space<vmem>>, vector<128x128xf32>
    %cst_13 = arith.constant dense<0.000000e+00> : vector<8x128xf32>
    %14 = tpu.matmul %12, %13, %cst_13 {dimension_numbers = #tpu.dot_dimension_numbers<[1], [0], [0], [1], [0, 0, 1, 1], [], []>} : vector<8x128xf32>, vector<128x128xf32>, vector<8x128xf32> -> vector<8x128xf32>
    %15 = arith.subf %12, %14 : vector<8x128xf32>
    %16 = arith.mulf %15, %15 : vector<8x128xf32>
    %c0_14 = arith.constant 0 : index
    %c0_15 = arith.constant 0 : index
    %17 = vector.load %arg8[%c0_14, %c0_15] : memref<128x128xf32, #tpu.memory_space<vmem>>, vector<128x128xf32>
    %cst_16 = arith.constant dense<0.000000e+00> : vector<8x128xf32>
    %18 = tpu.matmul %16, %17, %cst_16 {dimension_numbers = #tpu.dot_dimension_numbers<[1], [0], [0], [1], [0, 0, 1, 1], [], []>} : vector<8x128xf32>, vector<128x128xf32>, vector<8x128xf32> -> vector<8x128xf32>
    %cst_17 = arith.constant 9.99999974E-6 : f32
    %19 = vector.broadcast %cst_17 : f32 to vector<8x128xf32>
    %20 = arith.addf %18, %19 : vector<8x128xf32>
    %21 = math.rsqrt %20 : vector<8x128xf32>
    %22 = arith.mulf %15, %21 : vector<8x128xf32>
    %c0_18 = arith.constant 0 : index
    %c0_19 = arith.constant 0 : index
    %23 = vector.load %arg6[%c0_18, %c0_19] : memref<1x128xf32, #tpu.memory_space<vmem>>, vector<1x128xf32>
    %24 = vector.broadcast %23 : vector<1x128xf32> to vector<8x128xf32>
    %25 = arith.mulf %22, %24 : vector<8x128xf32>
    %c0_20 = arith.constant 0 : index
    %c0_21 = arith.constant 0 : index
    %26 = vector.load %arg7[%c0_20, %c0_21] : memref<1x128xf32, #tpu.memory_space<vmem>>, vector<1x128xf32>
    %27 = vector.broadcast %26 : vector<1x128xf32> to vector<8x128xf32>
    %28 = arith.addf %25, %27 : vector<8x128xf32>
    %c0_22 = arith.constant 0 : index
    %c0_23 = arith.constant 0 : index
    %29 = vector.load %arg9[%c0_22, %c0_23] : memref<8x128xf32, #tpu.memory_space<vmem>>, vector<8x128xf32>
    tpu.vector_store %arg9[%c0_22, %c0_23], %28 {strides = array<i32>} : memref<8x128xf32, #tpu.memory_space<vmem>>, vector<8x128xf32>,
    return
  }
  func.func @transform_0(%arg0: i32) -> (i32, i32) {
    %c0_i32 = arith.constant 0 : i32
    %c0_i32_0 = arith.constant 0 : i32
    return %arg0, %c0_i32 : i32, i32
  }
  func.func @transform_1(%arg0: i32) -> (i32, i32) {
    %c0_i32 = arith.constant 0 : i32
    %c0_i32_0 = arith.constant 0 : i32
    %c0_i32_1 = arith.constant 0 : i32
    return %c0_i32, %c0_i32_0 : i32, i32
  }
  func.func @transform_2(%arg0: i32) -> (i32, i32) {
    %c0_i32 = arith.constant 0 : i32
    %c0_i32_0 = arith.constant 0 : i32
    %c0_i32_1 = arith.constant 0 : i32
    return %c0_i32, %c0_i32_0 : i32, i32
  }
  func.func @transform_3(%arg0: i32) -> (i32, i32) {
    %c0_i32 = arith.constant 0 : i32
    %c0_i32_0 = arith.constant 0 : i32
    %c0_i32_1 = arith.constant 0 : i32
    return %c0_i32, %c0_i32_0 : i32, i32
  }
  func.func @transform_4(%arg0: i32) -> (i32, i32) {
    %c0_i32 = arith.constant 0 : i32
    %c0_i32_0 = arith.constant 0 : i32
    %c0_i32_1 = arith.constant 0 : i32
    return %c0_i32, %c0_i32_0 : i32, i32
  }
  func.func @transform_5(%arg0: i32) -> (i32, i32) {
    %c0_i32 = arith.constant 0 : i32
    %c0_i32_0 = arith.constant 0 : i32
    %c0_i32_1 = arith.constant 0 : i32
    return %c0_i32, %c0_i32_0 : i32, i32
  }
  func.func @transform_6(%arg0: i32) -> (i32, i32) {
    %c0_i32 = arith.constant 0 : i32
    %c0_i32_0 = arith.constant 0 : i32
    %c0_i32_1 = arith.constant 0 : i32
    return %c0_i32, %c0_i32_0 : i32, i32
  }
  func.func @transform_7(%arg0: i32) -> (i32, i32) {
    %c0_i32 = arith.constant 0 : i32
    %c0_i32_0 = arith.constant 0 : i32
    %c0_i32_1 = arith.constant 0 : i32
    return %c0_i32, %c0_i32_0 : i32, i32
  }
  func.func @transform_8(%arg0: i32) -> (i32, i32) {
    %c0_i32 = arith.constant 0 : i32
    %c0_i32_0 = arith.constant 0 : i32
    return %arg0, %c0_i32 : i32, i32
  }
}

</mosaic_0001>

<bundles_post_ra>
// kernel: tpu_custom_call.1
= control target key start
LH: loop header
LB: loop body
LE: loop exit
PB: predicated region body
PF: predicated region fallthrough
CT: control target
= control target key end

     0   :  { %13 = vsyncpa [#allocation3], 0  ;;  %s623_s0 = inlined_call_operand.hbm [shape: f32[4,128], index: 0, kind: input, shape index: {}]   ;;  %s624_s1 = inlined_call_operand.hbm [shape: f32[128,256], index: 1, kind: input, shape index: {}]   ;;  %s625_s2 = inlined_call_operand.hbm [shape: f32[1,256], index: 2, kind: input, shape index: {}]   ;;  %s626_s3 = inlined_call_operand.hbm [shape: f32[256,128], index: 3, kind: input, shape index: {}]   ;;  %s627_s4 = inlined_call_operand.vmem [shape: f32[1,128], index: 4, kind: input, shape index: {}]   ;;  %s628_s5 = inlined_call_operand.vmem [shape: f32[1,128], index: 5, kind: input, shape index: {}]   ;;  %s629_s6 = inlined_call_operand.vmem [shape: f32[1,128], index: 6, kind: input, shape index: {}]   ;;  %s630_s7 = inlined_call_operand.hbm [shape: f32[128,128], index: 7, kind: input, shape index: {}]   ;;  %s631_s8 = inlined_call_operand.hbm [shape: f32[4,128], index: 8, kind: output, shape index: {}]  }
   0x1   :  { %14 = vsyncpa [#allocation6], 0 }
   0x2   :  { %15 = vsyncpa [#allocation9], 0 }
   0x3   :  { %16 = vsyncpa [#allocation4], 0  ;;  %s34_s29 = sshll.u32 %s624_s1, 4  ;;  %s35_s29 = int_to_ptr.hbm [resolvable:$true] %s34_s29 }
   0x4   :  { %20 = vsyncadd [#allocation3], 64  ;;  %s533_s30 = smov [#allocation5]   ;;  %s58_s12 = sshll.u32 %s626_s3, 4  ;;  %s59_s12 = int_to_ptr.hbm [resolvable:$true] %s58_s12 }
   0x5   :  { %s36_s9 = sshll.u32 %s533_s30, 4  ;;  %s534_s13 = smov 256   ;;  %s37_s9 = int_to_ptr.vmem [resolvable:$true] %s36_s9 }
   0x6   :  { %s535_s14 = smov 16   ;;  %s536_s15 = smov [#allocation8]  }
   0x7   :  { %42 = dma.hbm_to_vmem [thread:$0]  %s35_s29, 4096, %s37_s9, [#allocation6], %s534_s13, %s534_s13, %s535_s14  }
   0x8   :  { %s60_s16 = sshll.u32 %s536_s15, 4  ;;  %s537_s17 = smov 128   ;;  %s61_s16 = int_to_ptr.vmem [resolvable:$true] %s60_s16 }
   0x9   :  { %s538_s18 = smov 8   ;;  %s21_s20 = sshll.u32 %s623_s0, 4  ;;  %s22_s20 = int_to_ptr.hbm [resolvable:$true] %s21_s20 }
   0xa   :  { %66 = dma.hbm_to_vmem [thread:$0]  %s59_s12, 4096, %s61_s16, [#allocation9], %s537_s17, %s537_s17, %s538_s18  }
   0xb   :  { %s539_s21 = smov [#allocation2]   ;;  %s48_s24 = sshll.u32 %s625_s2, 4  ;;  %s49_s24 = int_to_ptr.hbm [resolvable:$true] %s48_s24 }
   0xc   :  { %s23_s22 = sshll.u32 %s539_s21, 4  ;;  %s540_s25 = smov 64   ;;  %s24_s22 = int_to_ptr.vmem [resolvable:$true] %s23_s22 }
   0xd   :  { %s541_s26 = smov 4   ;;  %s542_s27 = smov [#allocation7]  }
   0xe   :  { %29 = dma.hbm_to_vmem [thread:$0]  %s22_s20, 64, %s24_s22, [#allocation3], %s540_s25, %s540_s25, %s541_s26  }
   0xf   :  { %s50_s28 = sshll.u32 %s542_s27, 4  ;;  %s77_s0 = sshll.u32 %s630_s7, 4  ;;  %s51_s28 = int_to_ptr.vmem [resolvable:$true] %s50_s28  ;;  %s78_s0 = int_to_ptr.hbm [resolvable:$true] %s77_s0 }
  0x10   :  { %53 = dma.hbm_to_vmem [thread:$0]  %s49_s24, 32, %s51_s28, [#allocation6]  }
  0x11   :  { %s543_s9 = smov [#allocation10]  }
  0x12   :  { %s79_s10 = sshll.u32 %s543_s9, 4  ;;  %s80_s10 = int_to_ptr.vmem [resolvable:$true] %s79_s10 }
  0x13   :  { %85 = dma.hbm_to_vmem [thread:$0]  %s78_s0, 2048, %s80_s10, [#allocation9], %s537_s17, %s537_s17, %s538_s18  }
  0x14   :  { %525 = dma.done.wait [#allocation3], 128  }
  0x15   :  { %526 = vsyncadd [#allocation3], 4294967168 }
  0x16   :  { %527 = dma.done.wait [#allocation6], 4128  }
  0x17   :  { %528 = vsyncadd [#allocation6], 4294963168 }
  0x18   :  { %529 = dma.done.wait [#allocation9], 6144  }
  0x19   :  { %530 = vsyncadd [#allocation9], 4294961152  ;;  %v137_v0 = vld [vmem:[#allocation5 + $0xf0] sm:$0xff]  ;;  %v135_v1 = vld [vmem:[#allocation5 + $0xe0] sm:$0xff] }
  0x1a   :  { %v138_v2 = vld [vmem:[#allocation5 + $0xf8] sm:$0xff]  ;;  %145 = vmatpush.msra.mxu0 %v137_v0  ;;  %v136_v3 = vld [vmem:[#allocation5 + $0xe8] sm:$0xff]  ;;  %v133_v4 = vld [vmem:[#allocation5 + $0xd0] sm:$0xff] }
  0x1b   :  { %165 = vmatpush.msra.mxu1 %v138_v2  ;;  %v134_v5 = vld [vmem:[#allocation5 + $0xd8] sm:$0xff]  ;;  %v131_v6 = vld [vmem:[#allocation5 + $0xc0] sm:$0xff]  ;;  %v132_v7 = vld [vmem:[#allocation5 + $0xc8] sm:$0xff] }
  0x1c   :  { %146 = vmatpush.msra.mxu0 %v135_v1  ;;  %v129_v8 = vld [vmem:[#allocation5 + $0xb0] sm:$0xff]  ;;  %v130_v9 = vld [vmem:[#allocation5 + $0xb8] sm:$0xff]  ;;  %v127_v10 = vld [vmem:[#allocation5 + $0xa0] sm:$0xff] }
  0x1d   :  { %166 = vmatpush.msra.mxu1 %v136_v3  ;;  %v128_v11 = vld [vmem:[#allocation5 + $0xa8] sm:$0xff]  ;;  %v125_v12 = vld [vmem:[#allocation5 + $0x90] sm:$0xff]  ;;  %v126_v13 = vld [vmem:[#allocation5 + $0x98] sm:$0xff] }
  0x1e   :  { %147 = vmatpush.msra.mxu0 %v133_v4  ;;  %v202_v14 = vld [vmem:[#allocation8 + $0x78] sm:$0xff]  ;;  %v201_v15 = vld [vmem:[#allocation8 + $0x70] sm:$0xff]  ;;  %v124_v18 = vld [vmem:[#allocation5 + $0x88] sm:$0xff] }
  0x1f   :  { %167 = vmatpush.msra.mxu1 %v134_v5  ;;  %v218_v16 = vld [vmem:[#allocation8 + $0xf8] sm:$0xff]  ;;  %223 = vmatpush.msra.mxu2 %v202_v14  ;;  %v217_v19 = vld [vmem:[#allocation8 + $0xf0] sm:$0xff]  ;;  %v200_v20 = vld [vmem:[#allocation8 + $0x68] sm:$0xff] }
  0x20   :  { %148 = vmatpush.msra.mxu0 %v131_v6  ;;  %v123_v17 = vld [vmem:[#allocation5 + $0x80] sm:$0xff]  ;;  %243 = vmatpush.msra.mxu3 %v218_v16  ;;  %v216_v21 = vld [vmem:[#allocation8 + $0xe8] sm:$0xff]  ;;  %v122_v23 = vld [vmem:[#allocation5 + $0x78] sm:$0xff] }
  0x21   :  { %168 = vmatpush.msra.mxu1 %v132_v7  ;;  %v121_v22 = vld [vmem:[#allocation5 + $0x70] sm:$0xff]  ;;  %224 = vmatpush.msra.mxu2 %v201_v15  ;;  %v199_v24 = vld [vmem:[#allocation8 + $0x60] sm:$0xff]  ;;  %v198_v28 = vld [vmem:[#allocation8 + $0x58] sm:$0xff] }
  0x22   :  { %149 = vmatpush.msra.mxu0 %v129_v8  ;;  %244 = vmatpush.msra.mxu3 %v217_v19  ;;  %v215_v25 = vld [vmem:[#allocation8 + $0xe0] sm:$0xff]  ;;  %v214_v29 = vld [vmem:[#allocation8 + $0xd8] sm:$0xff]  ;;  %v117_v30 = vld [vmem:[#allocation5 + $0x50] sm:$0xff] }
  0x23   :  { %169 = vmatpush.msra.mxu1 %v130_v9  ;;  %v119_v26 = vld [vmem:[#allocation5 + $0x60] sm:$0xff]  ;;  %v120_v27 = vld [vmem:[#allocation5 + $0x68] sm:$0xff]  ;;  %225 = vmatpush.msra.mxu2 %v200_v20  ;;  %v118_v32 = vld [vmem:[#allocation5 + $0x58] sm:$0xff] }
  0x24   :  { %150 = vmatpush.msra.mxu0 %v127_v10  ;;  %245 = vmatpush.msra.mxu3 %v216_v21  ;;  %v115_v31 = vld [vmem:[#allocation5 + $0x40] sm:$0xff]  ;;  %v197_v33 = vld [vmem:[#allocation8 + $0x50] sm:$0xff]  ;;  %v116_v35 = vld [vmem:[#allocation5 + $0x48] sm:$0xff] }
  0x25   :  { %170 = vmatpush.msra.mxu1 %v128_v11  ;;  %226 = vmatpush.msra.mxu2 %v199_v24  ;;  %v213_v34 = vld [vmem:[#allocation8 + $0xd0] sm:$0xff]  ;;  %v196_v36 = vld [vmem:[#allocation8 + $0x48] sm:$0xff]  ;;  %v195_v40 = vld [vmem:[#allocation8 + $0x40] sm:$0xff] }
  0x26   :  { %151 = vmatpush.msra.mxu0 %v125_v12  ;;  %246 = vmatpush.msra.mxu3 %v215_v25  ;;  %v212_v37 = vld [vmem:[#allocation8 + $0xc8] sm:$0xff]  ;;  %v114_v39 = vld [vmem:[#allocation5 + $0x38] sm:$0xff]  ;;  %v211_v41 = vld [vmem:[#allocation8 + $0xc0] sm:$0xff] }
  0x27   :  { %171 = vmatpush.msra.mxu1 %v126_v13  ;;  %227 = vmatpush.msra.mxu2 %v198_v28  ;;  %v113_v38 = vld [vmem:[#allocation5 + $0x30] sm:$0xff]  ;;  %v111_v42 = vld [vmem:[#allocation5 + $0x20] sm:$0xff]  ;;  %v112_v43 = vld [vmem:[#allocation5 + $0x28] sm:$0xff] }
  0x28   :  { %152 = vmatpush.msra.mxu0 %v123_v17  ;;  %247 = vmatpush.msra.mxu3 %v214_v29  ;;  %v194_v44 = vld [vmem:[#allocation8 + $0x38] sm:$0xff]  ;;  %v109_v46 = vld [vmem:[#allocation5 + $0x10] sm:$0xff]  ;;  %v108_v51 = vld [vmem:[#allocation5 + $0x8] sm:$0xff] }
  0x29   :  { %172 = vmatpush.msra.mxu1 %v124_v18  ;;  %228 = vmatpush.msra.mxu2 %v197_v33  ;;  %v210_v45 = vld [vmem:[#allocation8 + $0xb8] sm:$0xff]  ;;  %v193_v48 = vld [vmem:[#allocation8 + $0x30] sm:$0xff]  ;;  %v192_v53 = vld [vmem:[#allocation8 + $0x28] sm:$0xff] }
  0x2a   :  { %153 = vmatpush.msra.mxu0 %v121_v22  ;;  %248 = vmatpush.msra.mxu3 %v213_v34  ;;  %v110_v47 = vld [vmem:[#allocation5 + $0x18] sm:$0xff]  ;;  %v107_v50 = vld [vmem:[#allocation5] sm:$0xff]  ;;  %v208_v54 = vld [vmem:[#allocation8 + $0xa8] sm:$0xff] }
  0x2b   :  { %173 = vmatpush.msra.mxu1 %v122_v23  ;;  %229 = vmatpush.msra.mxu2 %v196_v36  ;;  %v209_v49 = vld [vmem:[#allocation8 + $0xb0] sm:$0xff]  ;;  %v191_v55 = vld [vmem:[#allocation8 + $0x20] sm:$0xff]  ;;  %v190_v57 = vld [vmem:[#allocation8 + $0x18] sm:$0xff] }
  0x2c   :  { %154 = vmatpush.msra.mxu0 %v119_v26  ;;  %249 = vmatpush.msra.mxu3 %v212_v37  ;;  %v106_v52 = vld [vmem:[#allocation2] sm:$0xff]  ;;  %v207_v56 = vld [vmem:[#allocation8 + $0xa0] sm:$0xff]  ;;  %v188_v60 = vld [vmem:[#allocation8 + $0x8] sm:$0xff] }
  0x2d   :  { %174 = vmatpush.msra.mxu1 %v120_v27  ;;  %230 = vmatpush.msra.mxu2 %v195_v40  ;;  %v189_v58 = vld [vmem:[#allocation8 + $0x10] sm:$0xff]  ;;  %v206_v59 = vld [vmem:[#allocation8 + $0x98] sm:$0xff]  ;;  %v187_v62 = vld [vmem:[#allocation8] sm:$0xff] }
  0x2e   :  { %155 = vmatpush.msra.mxu0 %v117_v30  ;;  %250 = vmatpush.msra.mxu3 %v211_v41  ;;  %v205_v61 = vld [vmem:[#allocation8 + $0x90] sm:$0xff]  ;;  %v204_v63 = vld [vmem:[#allocation8 + $0x88] sm:$0xff]  ;;  %v203_v0 = vld [vmem:[#allocation8 + $0x80] sm:$0xff] }
  0x2f   :  { %175 = vmatpush.msra.mxu1 %v118_v32  ;;  %231 = vmatpush.msra.mxu2 %v194_v44  ;;  %v278_v1 = vld [vmem:[#allocation10 + $0x78] sm:$0xff]  ;;  %v277_v2 = vld [vmem:[#allocation10 + $0x70] sm:$0xff]  ;;  %v276_v3 = vld [vmem:[#allocation10 + $0x68] sm:$0xff] }
  0x30   :  { %156 = vmatpush.msra.mxu0 %v115_v31  ;;  %251 = vmatpush.msra.mxu3 %v210_v45  ;;  %v275_v4 = vld [vmem:[#allocation10 + $0x60] sm:$0xff]  ;;  %v274_v5 = vld [vmem:[#allocation10 + $0x58] sm:$0xff]  ;;  %v273_v6 = vld [vmem:[#allocation10 + $0x50] sm:$0xff] }
  0x31   :  { %176 = vmatpush.msra.mxu1 %v116_v35  ;;  %232 = vmatpush.msra.mxu2 %v193_v48  ;;  %v272_v7 = vld [vmem:[#allocation10 + $0x48] sm:$0xff]  ;;  %v271_v8 = vld [vmem:[#allocation10 + $0x40] sm:$0xff]  ;;  %v270_v9 = vld [vmem:[#allocation10 + $0x38] sm:$0xff] }
  0x32   :  { %157 = vmatpush.msra.mxu0 %v113_v38  ;;  %252 = vmatpush.msra.mxu3 %v209_v49  ;;  %v269_v10 = vld [vmem:[#allocation10 + $0x30] sm:$0xff]  ;;  %v268_v11 = vld [vmem:[#allocation10 + $0x28] sm:$0xff]  ;;  %v267_v12 = vld [vmem:[#allocation10 + $0x20] sm:$0xff] }
  0x33   :  { %177 = vmatpush.msra.mxu1 %v114_v39  ;;  %233 = vmatpush.msra.mxu2 %v192_v53  ;;  %v139_v13 = vld [vmem:[#allocation7] sm:$0x3]  ;;  %v265_v23 = vld [vmem:[#allocation10 + $0x10] sm:$0xff]  ;;  %v264_v24 = vld [vmem:[#allocation10 + $0x8] sm:$0xff] }
  0x34   :  { %158 = vmatpush.msra.mxu0 %v111_v42  ;;  %253 = vmatpush.msra.mxu3 %v208_v54  ;;  %v266_v14 = vld [vmem:[#allocation10 + $0x18] sm:$0xff]  ;;  %v141_v15 = vperm.slane %v139_v13, 0  ;;  %v142_v16 = vperm.slane %v139_v13, 1  ;;  %v263_v25 = vld [vmem:[#allocation10] sm:$0xff]  ;;  %v376_v26 = vld [vmem:[%s627_s4] ss:$0 sm:$0xff] }
  0x35   :  { %178 = vmatpush.msra.mxu1 %v112_v43  ;;  %234 = vmatpush.msra.mxu2 %v191_v55  ;;  %v377_v42 = vld [vmem:[%s628_s5] ss:$0 sm:$0xff] }
  0x36   :  { %159 = vmatpush.msra.mxu0 %v109_v46  ;;  %254 = vmatpush.msra.mxu3 %v207_v56  ;;  %v378_v45 = vld [vmem:[%s629_s6] ss:$0 sm:$0xff] }
  0x37   :  { %179 = vmatpush.msra.mxu1 %v110_v47  ;;  %235 = vmatpush.msra.mxu2 %v190_v57 }
  0x38   :  { %160 = vmatpush.msra.mxu0 %v107_v50  ;;  %255 = vmatpush.msra.mxu3 %v206_v59 }
  0x39   :  { %180 = vmatpush.msra.mxu1 %v108_v51  ;;  %161 = vmatmul.f32.vlgmr.msra.gmra.mxu0 %v106_v52 }
  0x3a   :  { %181 = vmatmul.f32.vlgmr.msra.gmra.mxu1 %v106_v52  ;;  %236 = vmatpush.msra.mxu2 %v189_v58 }
  0x3b   :  { %256 = vmatpush.msra.mxu3 %v205_v61  ;;  %279 = vmatpush.msrb.mxu0 %v278_v1 }
  0x3c   :  { %237 = vmatpush.msra.mxu2 %v188_v60  ;;  %301 = vmatpush.msrb.mxu1 %v278_v1 }
  0x3d   :  { %257 = vmatpush.msra.mxu3 %v204_v63  ;;  %280 = vmatpush.msrb.mxu0 %v277_v2 }
  0x3e   :  { %238 = vmatpush.msra.mxu2 %v187_v62  ;;  %302 = vmatpush.msrb.mxu1 %v277_v2 }
  0x3f   :  { %258 = vmatpush.msra.mxu3 %v203_v0  ;;  %281 = vmatpush.msrb.mxu0 %v276_v3 }
  0x40   :  { %303 = vmatpush.msrb.mxu1 %v276_v3 }
  0x41   :  { %282 = vmatpush.msrb.mxu0 %v275_v4 }
  0x42   :  { %304 = vmatpush.msrb.mxu1 %v275_v4 }
  0x43   :  { %283 = vmatpush.msrb.mxu0 %v274_v5 }
  0x44   :  { %305 = vmatpush.msrb.mxu1 %v274_v5 }
  0x45   :  { %284 = vmatpush.msrb.mxu0 %v273_v6 }
  0x46   :  { %306 = vmatpush.msrb.mxu1 %v273_v6 }
  0x47   :  { %285 = vmatpush.msrb.mxu0 %v272_v7 }
  0x48   :  { %307 = vmatpush.msrb.mxu1 %v272_v7 }
  0x49   :  { %286 = vmatpush.msrb.mxu0 %v271_v8 }
  0x4a   :  { %308 = vmatpush.msrb.mxu1 %v271_v8 }
  0x4b   :  { %287 = vmatpush.msrb.mxu0 %v270_v9 }
  0x4c   :  { %309 = vmatpush.msrb.mxu1 %v270_v9 }
  0x4d   :  { %288 = vmatpush.msrb.mxu0 %v269_v10 }
  0x4e   :  { %310 = vmatpush.msrb.mxu1 %v269_v10 }
  0x4f   :  { %289 = vmatpush.msrb.mxu0 %v268_v11 }
  0x50   :  { %311 = vmatpush.msrb.mxu1 %v268_v11 }
  0x51   :  { %290 = vmatpush.msrb.mxu0 %v267_v12 }
  0x52   :  { %312 = vmatpush.msrb.mxu1 %v267_v12 }
  0x53   :  { %291 = vmatpush.msrb.mxu0 %v266_v14 }
  0x54   :  { %313 = vmatpush.msrb.mxu1 %v266_v14 }
  0x55   :  { %292 = vmatpush.msrb.mxu0 %v265_v23 }
  0x56   :  { %314 = vmatpush.msrb.mxu1 %v265_v23 }
  0x57   :  { %293 = vmatpush.msrb.mxu0 %v264_v24 }
  0x58   :  { %315 = vmatpush.msrb.mxu1 %v264_v24 }
  0x59   :  { %294 = vmatpush.msrb.mxu0 %v263_v25 }
  0x5a   :  { %316 = vmatpush.msrb.mxu1 %v263_v25 }
  0xb6   :  { %v162_v17 = vpop.f32.mrf.mxu0 }
  0xb7   :  { %v182_v18 = vpop.f32.mrf.mxu1  ;;  %v163_v19 = vadd.f32 %v162_v17, %v141_v15 }
  0xb8   :  { %v183_v20 = vadd.f32 %v182_v18, %v142_v16 }
  0xb9   :  { %v185_v21 = vmax.f32 %v163_v19, 0.0 }
  0xba   :  { %v186_v22 = vmax.f32 %v183_v20, 0.0 }
  0xbb   :  { %239 = vmatmul.f32.vlgmr.msra.gmra.mxu2 %v185_v21 }
  0xbc   :  { %259 = vmatmul.f32.vlgmr.msra.gmra.mxu3 %v186_v22 }
 0x13e   :  { %v240_v27 = vpop.f32.mrf.mxu2 }
 0x13f   :  { %v260_v28 = vpop.f32.mrf.mxu3  ;;  %v241_v29 = vadd.f32 %v376_v26, %v240_v27 }
 0x141   :  { %v261_v30 = vadd.f32 %v260_v28, %v241_v29 }
 0x143   :  { %295 = vmatmul.f32.vlgmr.msrb.gmra.mxu0 %v261_v30 }
 0x1c0   :  { %v296_v31 = vpop.f32.mrf.mxu0 }
 0x1c1   :  { %v299_v32 = vsub.f32 %v261_v30, %v296_v31 }
 0x1c3   :  { %v300_v33 = vmul.f32 %v299_v32, %v299_v32 }
 0x1c5   :  { %317 = vmatmul.f32.vlgmr.msrb.gmra.mxu1 %v300_v33 }
 0x242   :  { %v318_v34 = vpop.f32.mrf.mxu1 }
 0x243   :  { %v319_v35 = vadd.f32 1e-05, %v318_v34 }
 0x245   :  { %379 = vrsqrt.f32 %v319_v35  ;;  %vm327_vm1 = vweird.f32 %v319_v35 }
 0x24b   :  { %v380_v36 = vpop.eup %379 }
 0x24c   :  { %v322_v37 = vmul.f32 %v380_v36, %v319_v35  ;;  %vm328_vm0 = vweird.f32 %v380_v36 }
 0x24d   :  { %vm329_vm2 = vmor %vm327_vm1, %vm328_vm0 }
 0x24e   :  { %v323_v38 = vmul.f32 %v380_v36, %v322_v37 }
 0x250   :  { %v324_v39 = vmul.f32 0.5, %v323_v38 }
 0x252   :  { %v325_v40 = vsub.f32 1.5, %v324_v39 }
 0x254   :  { %v326_v41 = vmul.f32 %v380_v36, %v325_v40 }
 0x256   :  { %v330_v43 = vsel %vm329_vm2, %v380_v36, %v326_v41 }
 0x257   :  { %v331_v44 = vmul.f32 %v330_v43, %v299_v32 }
 0x259   :  { %v336_v46 = vmul.f32 %v377_v42, %v331_v44 }
 0x25b   :  { %v341_v47 = vadd.f32 %v378_v45, %v336_v46 }
 0x25d   :  { %342 = vst [vmem:[#allocation11] sm:$0xff] %v341_v47 }
 0x25e   :  { %346 = vsyncadd [#allocation4], 64  ;;  %s349_s16 = sshll.u32 %s631_s8, 4  ;;  %s544_s17 = smov [#allocation11]   ;;  %s350_s16 = int_to_ptr.hbm [resolvable:$true] %s349_s16 }
 0x25f   :  { %s347_s18 = sshll.u32 %s544_s17, 4  ;;  %s348_s18 = int_to_ptr.vmem [resolvable:$true] %s347_s18 }
 0x260   :  { %355 = dma.vmem_to_hbm [thread:$0]  %s348_s18, 64, %s350_s16, [#allocation4], %s540_s25, %s540_s25, %s541_s26  }
 0x261   :  { %531 = dma.done.wait [#allocation4], 128  }
 0x262   :  { %532 = vsyncadd [#allocation4], 4294967168 }
 0x263   :  { %360 = vsyncpa [#allocation3], 1 }
 0x264   :  { %361 = vsyncpa [#allocation6], 1 }
 0x265   :  { %362 = vsyncpa [#allocation9], 1 }
 0x266   :  { %363 = vsyncpa [#allocation4], 1 }

</bundles_post_ra>
